<compile_context>
chip_gen: v5e
topology: v5e:2x2
jax: 0.10.0
libtpu: 0.0.40
codegen_flags: <defaults>
</compile_context>

<pallas_src>
import math
import jax
import jax.numpy as jnp
from jax.experimental import pallas as pl
from jax.experimental.pallas import tpu as pltpu


# ----------------------------------------------------------------------------
# Pallas kernel: the entire MLPEncoder forward in one invocation.
# ----------------------------------------------------------------------------
def _make_mlp_kernel(activate_type):
    if activate_type == 'sigmoid':
        act = jax.nn.sigmoid
    elif activate_type == 'tanh':
        act = jnp.tanh
    elif activate_type == 'relu':
        act = lambda v: jnp.maximum(v, 0.0)
    else:  # activate_type is None -> identity (mirrors the PyTorch module)
        act = lambda v: v

    def kernel(x_ref, w1_ref, b1_ref, w2_ref, b2_ref, o_ref):
        # hidden1: (B, max_len*input_size) @ (max_len*input_size, H) + b1
        h = jnp.dot(x_ref[...], w1_ref[...], preferred_element_type=jnp.float32)
        h = act(h + b1_ref[...])                      # VPU/EUP, stays in vregs
        # hidden2: (B, H) @ (H, out_size) + b2 -> single output store
        o_ref[...] = (
            jnp.dot(h, w2_ref[...], preferred_element_type=jnp.float32)
            + b2_ref[...]
        ).astype(o_ref.dtype)

    return kernel


# ----------------------------------------------------------------------------
# Wrapper: flatten (x.view(B, -1)) then run the fused kernel.
# ----------------------------------------------------------------------------
def mlp_encoder_forward(x, params, activate_type='relu'):
    """x: (B, max_len, input_size) -> (B, out_size)."""
    w1, b1, w2, b2 = params
    B = x.shape[0]
    x_flat = x.reshape(B, -1).astype(jnp.float32)     # x.view(B, -1)
    out_size = w2.shape[-1]

    vmem = pl.BlockSpec(memory_space=pltpu.MemorySpace.VMEM)
    return pl.pallas_call(
        _make_mlp_kernel(activate_type),
        out_shape=jax.ShapeDtypeStruct((B, out_size), jnp.float32),
        in_specs=[vmem, vmem, vmem, vmem, vmem],
        out_specs=vmem,
    )(x_flat, w1, b1, w2, b2)


# ----------------------------------------------------------------------------
# Pure-JAX reference (same math) for a correctness sanity check.
# ----------------------------------------------------------------------------
def mlp_reference(x, params, activate_type='relu'):
    w1, b1, w2, b2 = params
    B = x.shape[0]
    h = x.reshape(B, -1).astype(jnp.float32) @ w1 + b1
    if activate_type == 'sigmoid':
        h = jax.nn.sigmoid(h)
    elif activate_type == 'tanh':
        h = jnp.tanh(h)
    elif activate_type == 'relu':
        h = jnp.maximum(h, 0.0)
    return h @ w2 + b2


# ----------------------------------------------------------------------------
# Deterministic parameter init (PyTorch nn.Linear default: U(-1/sqrt(fan_in), ...)).
# Weights are stored (in_features, out_features) so the kernel does x @ W.
# ----------------------------------------------------------------------------
def init_mlp_params(key, max_len, input_size, mlp_hidden, out_size):
    k1, k2, k3, k4 = jax.random.split(key, 4)
    fan_in1 = max_len * input_size
    bound1 = 1.0 / math.sqrt(fan_in1)
    w1 = jax.random.uniform(k1, (fan_in1, mlp_hidden), jnp.float32, -bound1, bound1)
    b1 = jax.random.uniform(k2, (1, mlp_hidden), jnp.float32, -bound1, bound1)
    bound2 = 1.0 / math.sqrt(mlp_hidden)
    w2 = jax.random.uniform(k3, (mlp_hidden, out_size), jnp.float32, -bound2, bound2)
    b2 = jax.random.uniform(k4, (1, out_size), jnp.float32, -bound2, bound2)
    return (w1, b1, w2, b2)


if __name__ == "__main__":
    # config: max_len=8, input_size=4, mlp_config.hidden_size=32,
    #         hidden_size (out_size)=32, activate_type='relu'
    B, MAX_LEN, INPUT_SIZE = 2, 8, 4
    MLP_HIDDEN, OUT_SIZE = 32, 32
    ACT = 'relu'

    key = jax.random.PRNGKey(0)
    key_x, key_p = jax.random.split(key)
    x = jax.random.normal(key_x, (B, MAX_LEN, INPUT_SIZE), jnp.float32)
    params = init_mlp_params(key_p, MAX_LEN, INPUT_SIZE, MLP_HIDDEN, OUT_SIZE)

    out = jax.block_until_ready(mlp_encoder_forward(x, params, ACT))
    ref = jax.block_until_ready(mlp_reference(x, params, ACT))

    assert out.shape == (B, OUT_SIZE)
    assert jnp.allclose(out, ref, atol=1e-5, rtol=1e-5), "mismatch vs reference"

    print("KERNEL_OK")
</pallas_src>

<mosaic_0001>
module attributes {stable_mosaic.version = 11 : i64} {
  func.func @kernel(%arg0: memref<2x32xf32, #tpu.memory_space<vmem>>, %arg1: memref<32x32xf32, #tpu.memory_space<vmem>>, %arg2: memref<1x32xf32, #tpu.memory_space<vmem>>, %arg3: memref<32x32xf32, #tpu.memory_space<vmem>>, %arg4: memref<1x32xf32, #tpu.memory_space<vmem>>, %arg5: memref<2x32xf32, #tpu.memory_space<vmem>>) attributes {dimension_semantics = [], scalar_prefetch = 0 : i64, scratch_operands = 0 : i64, tpu.core_type = #tpu.core_type<tc>} {
    %c0 = arith.constant 0 : index
    %c0_0 = arith.constant 0 : index
    %0 = vector.load %arg0[%c0, %c0_0] : memref<2x32xf32, #tpu.memory_space<vmem>>, vector<2x32xf32>
    %c0_1 = arith.constant 0 : index
    %c0_2 = arith.constant 0 : index
    %1 = vector.load %arg1[%c0_1, %c0_2] : memref<32x32xf32, #tpu.memory_space<vmem>>, vector<32x32xf32>
    %cst = arith.constant dense<0.000000e+00> : vector<2x32xf32>
    %2 = tpu.matmul %0, %1, %cst {dimension_numbers = #tpu.dot_dimension_numbers<[1], [0], [0], [1], [0, 0, 1, 1], [], []>} : vector<2x32xf32>, vector<32x32xf32>, vector<2x32xf32> -> vector<2x32xf32>
    %c0_3 = arith.constant 0 : index
    %c0_4 = arith.constant 0 : index
    %3 = vector.load %arg2[%c0_3, %c0_4] : memref<1x32xf32, #tpu.memory_space<vmem>>, vector<1x32xf32>
    %4 = vector.broadcast %3 : vector<1x32xf32> to vector<2x32xf32>
    %5 = arith.addf %2, %4 : vector<2x32xf32>
    %cst_5 = arith.constant 0.000000e+00 : f32
    %6 = vector.broadcast %cst_5 : f32 to vector<2x32xf32>
    %7 = arith.maximumf %5, %6 : vector<2x32xf32>
    %c0_6 = arith.constant 0 : index
    %c0_7 = arith.constant 0 : index
    %8 = vector.load %arg3[%c0_6, %c0_7] : memref<32x32xf32, #tpu.memory_space<vmem>>, vector<32x32xf32>
    %cst_8 = arith.constant dense<0.000000e+00> : vector<2x32xf32>
    %9 = tpu.matmul %7, %8, %cst_8 {dimension_numbers = #tpu.dot_dimension_numbers<[1], [0], [0], [1], [0, 0, 1, 1], [], []>} : vector<2x32xf32>, vector<32x32xf32>, vector<2x32xf32> -> vector<2x32xf32>
    %c0_9 = arith.constant 0 : index
    %c0_10 = arith.constant 0 : index
    %10 = vector.load %arg4[%c0_9, %c0_10] : memref<1x32xf32, #tpu.memory_space<vmem>>, vector<1x32xf32>
    %11 = vector.broadcast %10 : vector<1x32xf32> to vector<2x32xf32>
    %12 = arith.addf %9, %11 : vector<2x32xf32>
    %c0_11 = arith.constant 0 : index
    %c0_12 = arith.constant 0 : index
    %13 = vector.load %arg5[%c0_11, %c0_12] : memref<2x32xf32, #tpu.memory_space<vmem>>, vector<2x32xf32>
    tpu.vector_store %arg5[%c0_11, %c0_12], %12 {strides = array<i32>} : memref<2x32xf32, #tpu.memory_space<vmem>>, vector<2x32xf32>,
    return
  }
}

</mosaic_0001>

<bundles_post_ra>
// kernel: tpu_custom_call.1
= control target key start
LH: loop header
LB: loop body
LE: loop exit
PB: predicated region body
PF: predicated region fallthrough
CT: control target
= control target key end

     0   :  { %10 = vsyncpa [#allocation3], 0  ;;  %s317_s0 = inlined_call_operand.hbm [shape: f32[2,32], index: 0, kind: input, shape index: {}]   ;;  %s318_s1 = inlined_call_operand.hbm [shape: f32[32,32], index: 1, kind: input, shape index: {}]   ;;  %s319_s2 = inlined_call_operand.vmem [shape: f32[1,32], index: 2, kind: input, shape index: {}]   ;;  %s320_s3 = inlined_call_operand.hbm [shape: f32[32,32], index: 3, kind: input, shape index: {}]   ;;  %s321_s4 = inlined_call_operand.vmem [shape: f32[1,32], index: 4, kind: input, shape index: {}]   ;;  %s322_s5 = inlined_call_operand.hbm [shape: f32[2,32], index: 5, kind: output, shape index: {}]  }
   0x1   :  { %11 = vsyncpa [#allocation6], 0  ;;  %s28_s20 = sshll.u32 %s318_s1, 4  ;;  %s29_s20 = int_to_ptr.hbm [resolvable:$true] %s28_s20 }
   0x2   :  { %12 = vsyncpa [#allocation4], 0  ;;  %s263_s21 = smov [#allocation5]   ;;  %s18_s25 = sshll.u32 %s317_s0, 4  ;;  %s19_s25 = int_to_ptr.hbm [resolvable:$true] %s18_s25 }
   0x3   :  { %s30_s22 = sshll.u32 %s263_s21, 4  ;;  %s264_s26 = smov 128   ;;  %s31_s22 = int_to_ptr.vmem [resolvable:$true] %s30_s22 }
   0x4   :  { %s265_s27 = smov 8   ;;  %s266_s28 = smov [#allocation2]  }
   0x5   :  { %36 = dma.hbm_to_vmem [thread:$0]  %s29_s20, 512, %s31_s22, [#allocation6], %s264_s26, %s264_s26, %s265_s27  }
   0x6   :  { %s20_s29 = sshll.u32 %s266_s28, 4  ;;  %s43_s7 = sshll.u32 %s320_s3, 4  ;;  %s21_s29 = int_to_ptr.vmem [resolvable:$true] %s20_s29  ;;  %s44_s7 = int_to_ptr.hbm [resolvable:$true] %s43_s7 }
   0x7   :  { %23 = dma.hbm_to_vmem [thread:$0]  %s19_s25, 32, %s21_s29, [#allocation3]  }
   0x8   :  { %s267_s1 = smov [#allocation7]  }
   0x9   :  { %s45_s8 = sshll.u32 %s267_s1, 4  ;;  %s46_s8 = int_to_ptr.vmem [resolvable:$true] %s45_s8 }
   0xa   :  { %51 = dma.hbm_to_vmem [thread:$0]  %s44_s7, 512, %s46_s8, [#allocation6], %s264_s26, %s264_s26, %s265_s27  }
   0xb   :  { %257 = dma.done.wait [#allocation3], 32  }
   0xc   :  { %258 = vsyncadd [#allocation3], 4294967264 }
   0xd   :  { %259 = dma.done.wait [#allocation6], 1024  }
   0xe   :  { %260 = vsyncadd [#allocation6], 4294966272  ;;  %v70_v0 = vld [vmem:[#allocation5 + $0x18] sm:$0xff]  ;;  %v69_v1 = vld [vmem:[#allocation5 + $0x10] sm:$0xff]  ;;  %vm75_vm0 = vcmask 261120   ;;  %s268_s11 = smov [#allocation8]  }
   0xf   :  { %91 = vmatpush.msra.mxu0 %v70_v0  ;;  %v103_v2 = vld [vmem:[#allocation7 + $0x18] sm:$0xff]  ;;  %v68_v3 = vld [vmem:[#allocation5 + $0x8] sm:$0xff]  ;;  %v67_v4 = vld [vmem:[#allocation5] sm:$0xff]  ;;  %s138_s12 = sshll.u32 %s268_s11, 4  ;;  %s140_s15 = sshll.u32 %s322_s5, 4  ;;  %vm131_vm1 = vcmask 254976   ;;  %s139_s12 = int_to_ptr.vmem [resolvable:$true] %s138_s12  ;;  %s141_s15 = int_to_ptr.hbm [resolvable:$true] %s140_s15 }
  0x10   :  { %123 = vmatpush.msra.mxu1 %v103_v2  ;;  %v66_v5 = vld [vmem:[#allocation2] sm:$0x3]  ;;  %v102_v6 = vld [vmem:[#allocation7 + $0x10] sm:$0xff]  ;;  %v101_v7 = vld [vmem:[#allocation7 + $0x8] sm:$0xff] }
  0x11   :  { %92 = vmatpush.msra.mxu0 %v69_v1  ;;  %v100_v8 = vld [vmem:[#allocation7] sm:$0xff]  ;;  %v159_v9 = vld [vmem:[%s319_s2] ss:$0 sm:$0xff] }
  0x12   :  { %124 = vmatpush.msra.mxu1 %v102_v6  ;;  %v160_v13 = vld [vmem:[%s321_s4] ss:$0 sm:$0xff] }
  0x13   :  { %93 = vmatpush.msra.mxu0 %v68_v3 }
  0x14   :  { %125 = vmatpush.msra.mxu1 %v101_v7 }
  0x15   :  { %94 = vmatpush.msra.mxu0 %v67_v4 }
  0x16   :  { %151 = vmatmul.msk.f32.vlgmr.msra.gmra.mxu0 %vm75_vm0, %v66_v5  ;;  %126 = vmatpush.msra.mxu1 %v100_v8 }
  0x93   :  { %v96_v10 = vpop.f32.mrf.mxu0 }
  0x94   :  { %v97_v11 = vadd.f32 %v159_v9, %v96_v10 }
  0x96   :  { %v99_v12 = vmax.f32 %v97_v11, 0.0 }
  0x98   :  { %152 = vmatmul.msk.f32.vlgmr.msra.gmra.mxu1 %vm75_vm0, %v99_v12 }
 0x115   :  { %v128_v14 = vpop.f32.mrf.mxu1 }
 0x116   :  { %v129_v15 = vadd.f32 %v160_v13, %v128_v14 }
 0x118   :  { %132 = vst.msk [vmem:[#allocation8] sm:$0x3] %vm131_vm1, %v129_v15 }
 0x119   :  { %143 = dma.vmem_to_hbm [thread:$0]  %s139_s12, 32, %s141_s15, [#allocation4]  }
 0x11a   :  { %261 = dma.done.wait [#allocation4], 32  }
 0x11b   :  { %262 = vsyncadd [#allocation4], 4294967264 }
 0x11c   :  { %148 = vsyncpa [#allocation3], 1 }
 0x11d   :  { %149 = vsyncpa [#allocation6], 1 }
 0x11e   :  { %150 = vsyncpa [#allocation4], 1 }

</bundles_post_ra>
